<compile_context>
chip_gen: v7x
topology: tpu7x:2x2x1
jax: 0.10.0
libtpu: 0.0.40
codegen_flags: <defaults>
</compile_context>

<pallas_src>
import math
import jax
import jax.numpy as jnp
from jax.experimental import pallas as pl
from jax.experimental.pallas import tpu as pltpu

# ---- model dimensions (small, consistent with the module's forward) ----
OBS_DIM    = 32     # proprioception dim (set by the RL environment)
HIDDEN     = 128    # synthetic backbone hidden size (lane-aligned)
SEQ        = 8      # backbone sequence length (mean-pooled, dim=1)
HORIZON    = 4      # action horizon of action_pred
A_MODEL    = 8      # model action dim (> ACTION_DIM, exercises truncation)
ACTION_DIM = 4      # RL action dim
VH         = 256    # value-head hidden
ACTION_STD = 0.1

# fused output slab: [action(4) | logp | value | pad(2)]  (cols 6..7 unused)
OUT_W      = 8
_COL_LOGP  = ACTION_DIM
_COL_VALUE = ACTION_DIM + 1

_LOG_STD    = math.log(ACTION_STD)
_LOG_2PI    = math.log(2.0 * math.pi)
_LOGP_CONST = ACTION_DIM * (_LOG_STD + 0.5 * _LOG_2PI)
_ENTROPY    = ACTION_DIM * (0.5 + 0.5 * _LOG_2PI + _LOG_STD)


def _policy_kernel(obs_ref, noise_ref,
                   wbb_ref, bbb_ref, pos_ref,
                   wact_ref, bact_ref,
                   w1_ref, b1_ref, w2_ref, b2_ref, w3_ref, b3_ref,
                   out_ref):
    # ---- synthetic GR00T backbone ("autocast": bf16 operands, f32 accumulate) ----
    # obs is pre-cast to bf16 on the host; no per-step VPU cast here.
    h = jnp.dot(obs_ref[...], wbb_ref[...],
                preferred_element_type=jnp.float32) + bbb_ref[...]      # (Bt, H) f32
    hb = h.astype(jnp.bfloat16)                                         # cast once

    # pooled = mean_s tanh(h + pos[s]) — unrolled 2-D accumulation, no 3-D
    # intermediate and no sublane reduction.  tanh runs in bf16 (EUP slot on
    # v6e/v7x); the running sum stays f32.
    pos = pos_ref[...]                                                  # (S, H) bf16
    acc = jnp.tanh(hb + pos[0:1, :]).astype(jnp.float32)
    for s in range(1, SEQ):
        acc = acc + jnp.tanh(hb + pos[s:s + 1, :])
    pooled = acc * (1.0 / SEQ)                                          # (Bt, H) f32
    pooled_bf = pooled.astype(jnp.bfloat16)                             # shared by both heads

    # ---- action head: only t=0 and the first ACTION_DIM columns are needed;
    #      temb[0, :ACTION_DIM] is folded into bact on the host ----
    action_mean = jnp.dot(pooled_bf, wact_ref[...],
                          preferred_element_type=jnp.float32) + bact_ref[...]
    # mimic bf16 autocast output dtype of the torch model
    action_mean = action_mean.astype(jnp.bfloat16).astype(jnp.float32)

    # ---- Normal(mean, 0.1): sample with provided standard-normal noise ----
    noise = noise_ref[...]                                              # (Bt, A) f32
    action = action_mean + ACTION_STD * noise
    # z = (action - mean) / std == noise  ->  log_prob directly from the noise
    logp = -0.5 * jnp.sum(noise * noise, axis=-1, keepdims=True) - _LOGP_CONST

    # ---- value head: Linear->ReLU->Linear->ReLU->Linear.
    # bf16 MXU passes with f32 accumulation (single-pass MXU, half the weight
    # bytes); biases, ReLUs and the final (256->1) projection stay f32.
    v = jnp.dot(pooled_bf, w1_ref[...],
                preferred_element_type=jnp.float32) + b1_ref[...]       # (Bt, VH) f32
    v = jnp.maximum(v, 0.0)
    v = jnp.dot(v.astype(jnp.bfloat16), w2_ref[...],
                preferred_element_type=jnp.float32) + b2_ref[...]       # (Bt, VH) f32
    v = jnp.maximum(v, 0.0)
    # (VH, 1) projection as a VPU multiply + lane reduction (avoids N=1 MXU pass)
    value = jnp.sum(v * w3_ref[...], axis=-1, keepdims=True) + b3_ref[...]   # (Bt, 1)

    # ---- narrow output slab: three small stores, no full-tile zero fill.
    # Columns 6..7 are intentionally left unwritten; the wrapper never reads them.
    out_ref[:, 0:ACTION_DIM] = action
    out_ref[:, _COL_LOGP:_COL_LOGP + 1] = logp
    out_ref[:, _COL_VALUE:_COL_VALUE + 1] = value


def _full_spec(shape):
    nd = len(shape)
    return pl.BlockSpec(shape, lambda i, _nd=nd: (0,) * _nd)


def _pick_batch_tile(bn):
    """Single fat step for small batches; 128-row tiles otherwise.

    At tiny tiles the ~0.35us/step pipeline overhead dominates, so batches up
    to 256 rows run as one grid step.  Larger batches use bt=128: enough rows
    to feed the MXU, bounded vreg/store pressure on v5e, and >=2 "parallel"
    grid steps so both v7x TensorCores get work.
    """
    bn8 = ((bn + 7) // 8) * 8
    if bn8 <= 256:
        bt = bn8
    else:
        bt = 128
    bn_pad = ((bn8 + bt - 1) // bt) * bt
    return bt, bn_pad


def _prepare_kernel_params(params):
    """Fold / pre-cast module params into the layout the kernel consumes."""
    wact = params["wact"][:, :ACTION_DIM].astype(jnp.bfloat16)            # (H, A) bf16
    bact = (params["bact"][:, :ACTION_DIM]
            + params["temb"][0:1, :ACTION_DIM]).astype(jnp.float32)       # (1, A) f32
    return (
        params["wbb"].astype(jnp.bfloat16),      # (OBS, H) bf16
        params["bbb"].astype(jnp.float32),       # (1, H)   f32
        params["pos"].astype(jnp.bfloat16),      # (S, H)   bf16
        wact, bact,
        params["w1"].astype(jnp.bfloat16),       # (H, VH)  bf16
        params["b1"].astype(jnp.float32),        # (1, VH)  f32
        params["w2"].astype(jnp.bfloat16),       # (VH, VH) bf16
        params["b2"].astype(jnp.float32),        # (1, VH)  f32
        params["w3"].reshape(1, VH).astype(jnp.float32),   # (1, VH) f32 row for the VPU dot
        params["b3"].astype(jnp.float32),        # (1, 1)   f32
    )


def groot_rl_policy_forward(obs, noise, params):
    """Returns (action (B, A), log_prob (B,), entropy (B,), value (B,))."""
    bn = obs.shape[0]
    bt, bn_pad = _pick_batch_tile(bn)

    obs_bf = obs.astype(jnp.bfloat16)            # host pre-cast: half the input DMA bytes
    noise = noise.astype(jnp.float32)
    if bn_pad != bn:
        obs_bf = jnp.pad(obs_bf, ((0, bn_pad - bn), (0, 0)))
        noise = jnp.pad(noise, ((0, bn_pad - bn), (0, 0)))

    weights = _prepare_kernel_params(params)

    in_specs = [
        pl.BlockSpec((bt, OBS_DIM), lambda i: (i, 0)),
        pl.BlockSpec((bt, ACTION_DIM), lambda i: (i, 0)),
    ] + [_full_spec(w.shape) for w in weights]

    out = pl.pallas_call(
        _policy_kernel,
        out_shape=jax.ShapeDtypeStruct((bn_pad, OUT_W), jnp.float32),
        grid_spec=pltpu.PrefetchScalarGridSpec(
            num_scalar_prefetch=0,
            grid=(bn_pad // bt,),
            in_specs=in_specs,
            out_specs=pl.BlockSpec((bt, OUT_W), lambda i: (i, 0)),
        ),
        compiler_params=pltpu.CompilerParams(
            dimension_semantics=("parallel",)),
    )(obs_bf, noise, *weights)

    action = out[:bn, :ACTION_DIM]
    logp = out[:bn, _COL_LOGP]
    value = out[:bn, _COL_VALUE]
    # entropy of Normal(mean, 0.1) is a compile-time constant -> wrapper-side
    ent = jnp.full((bn,), _ENTROPY, jnp.float32)
    return action, logp, ent, value


def forward(obs, noise, params):
    """Matches GR00TRLPolicy.forward: returns (action, value)."""
    action, _logp, _ent, value = groot_rl_policy_forward(obs, noise, params)
    return action, value


def _init_params(key):
    ks = jax.random.split(key, 7)

    def linear(kw, fan_in, fan_out):
        bound = 1.0 / math.sqrt(fan_in)
        k1, k2 = jax.random.split(kw)
        w = jax.random.uniform(k1, (fan_in, fan_out), jnp.float32, -bound, bound)
        b = jax.random.uniform(k2, (1, fan_out), jnp.float32, -bound, bound)
        return w, b

    wbb, bbb = linear(ks[0], OBS_DIM, HIDDEN)
    wact, bact = linear(ks[1], HIDDEN, A_MODEL)
    w1, b1 = linear(ks[2], HIDDEN, VH)
    w2, b2 = linear(ks[3], VH, VH)
    w3, b3 = linear(ks[4], VH, 1)
    pos = 0.02 * jax.random.normal(ks[5], (SEQ, HIDDEN), jnp.float32)
    temb = 0.02 * jax.random.normal(ks[6], (HORIZON, A_MODEL), jnp.float32)
    return dict(wbb=wbb, bbb=bbb, pos=pos, wact=wact, bact=bact, temb=temb,
                w1=w1, b1=b1, w2=w2, b2=b2, w3=w3, b3=b3)


if __name__ == "__main__":
    B = 16   # small smoke-test batch -> single grid step of 16 rows

    key = jax.random.PRNGKey(0)
    k_obs, k_noise, k_par = jax.random.split(key, 3)

    observations = jax.random.normal(k_obs, (B, OBS_DIM), jnp.float32)
    # standard-normal noise for Normal(mean, 0.1).sample()
    noise = jax.random.normal(k_noise, (B, ACTION_DIM), jnp.float32)
    params = _init_params(k_par)

    action, value = forward(observations, noise, params)
    jax.block_until_ready((action, value))

    assert action.shape == (B, ACTION_DIM)
    assert value.shape == (B,)
    assert bool(jnp.all(jnp.isfinite(action))) and bool(jnp.all(jnp.isfinite(value)))
    print("KERNEL_OK")
</pallas_src>

<mosaic_0001>
module attributes {stable_mosaic.version = 11 : i64} {
  func.func @_policy_kernel(%arg0: i32, %arg1: memref<16x32xbf16, #tpu.memory_space<vmem>>, %arg2: memref<16x4xf32, #tpu.memory_space<vmem>>, %arg3: memref<32x128xbf16, #tpu.memory_space<vmem>>, %arg4: memref<1x128xf32, #tpu.memory_space<vmem>>, %arg5: memref<8x128xbf16, #tpu.memory_space<vmem>>, %arg6: memref<128x4xbf16, #tpu.memory_space<vmem>>, %arg7: memref<1x4xf32, #tpu.memory_space<vmem>>, %arg8: memref<128x256xbf16, #tpu.memory_space<vmem>>, %arg9: memref<1x256xf32, #tpu.memory_space<vmem>>, %arg10: memref<256x256xbf16, #tpu.memory_space<vmem>>, %arg11: memref<1x256xf32, #tpu.memory_space<vmem>>, %arg12: memref<1x256xf32, #tpu.memory_space<vmem>>, %arg13: memref<1x1xf32, #tpu.memory_space<vmem>>, %arg14: memref<16x8xf32, #tpu.memory_space<vmem>>) attributes {dimension_semantics = [#tpu.dimension_semantics<parallel>], iteration_bounds = array<i64: 1>, scalar_prefetch = 0 : i64, scratch_operands = 0 : i64, tpu.core_type = #tpu.core_type<tc>, window_params = [{transform_indices = @transform_0, window_bounds = array<i64: 16, 32>}, {transform_indices = @transform_1, window_bounds = array<i64: 16, 4>}, {pipeline_mode = #tpu.pipeline_mode<synchronous>, transform_indices = @transform_2, window_bounds = array<i64: 32, 128>}, {pipeline_mode = #tpu.pipeline_mode<synchronous>, transform_indices = @transform_3, window_bounds = array<i64: 1, 128>}, {pipeline_mode = #tpu.pipeline_mode<synchronous>, transform_indices = @transform_4, window_bounds = array<i64: 8, 128>}, {pipeline_mode = #tpu.pipeline_mode<synchronous>, transform_indices = @transform_5, window_bounds = array<i64: 128, 4>}, {pipeline_mode = #tpu.pipeline_mode<synchronous>, transform_indices = @transform_6, window_bounds = array<i64: 1, 4>}, {pipeline_mode = #tpu.pipeline_mode<synchronous>, transform_indices = @transform_7, window_bounds = array<i64: 128, 256>}, {pipeline_mode = #tpu.pipeline_mode<synchronous>, transform_indices = @transform_8, window_bounds = array<i64: 1, 256>}, {pipeline_mode = #tpu.pipeline_mode<synchronous>, transform_indices = @transform_9, window_bounds = array<i64: 256, 256>}, {pipeline_mode = #tpu.pipeline_mode<synchronous>, transform_indices = @transform_10, window_bounds = array<i64: 1, 256>}, {pipeline_mode = #tpu.pipeline_mode<synchronous>, transform_indices = @transform_11, window_bounds = array<i64: 1, 256>}, {pipeline_mode = #tpu.pipeline_mode<synchronous>, transform_indices = @transform_12, window_bounds = array<i64: 1, 1>}, {transform_indices = @transform_13, window_bounds = array<i64: 16, 8>}]} {
    %c0 = arith.constant 0 : index
    %c0_0 = arith.constant 0 : index
    %0 = vector.load %arg1[%c0, %c0_0] : memref<16x32xbf16, #tpu.memory_space<vmem>>, vector<16x32xbf16>
    %c0_1 = arith.constant 0 : index
    %c0_2 = arith.constant 0 : index
    %1 = vector.load %arg3[%c0_1, %c0_2] : memref<32x128xbf16, #tpu.memory_space<vmem>>, vector<32x128xbf16>
    %cst = arith.constant dense<0.000000e+00> : vector<16x128xf32>
    %2 = tpu.matmul %0, %1, %cst {dimension_numbers = #tpu.dot_dimension_numbers<[1], [0], [0], [1], [0, 0, 1, 1], [], []>} : vector<16x32xbf16>, vector<32x128xbf16>, vector<16x128xf32> -> vector<16x128xf32>
    %c0_3 = arith.constant 0 : index
    %c0_4 = arith.constant 0 : index
    %3 = vector.load %arg4[%c0_3, %c0_4] : memref<1x128xf32, #tpu.memory_space<vmem>>, vector<1x128xf32>
    %4 = vector.broadcast %3 : vector<1x128xf32> to vector<16x128xf32>
    %5 = arith.addf %2, %4 : vector<16x128xf32>
    %6 = arith.truncf %5 : vector<16x128xf32> to vector<16x128xbf16>
    %c0_5 = arith.constant 0 : index
    %c0_6 = arith.constant 0 : index
    %7 = vector.load %arg5[%c0_5, %c0_6] : memref<8x128xbf16, #tpu.memory_space<vmem>>, vector<8x128xbf16>
    %8 = vector.extract_strided_slice %7 {offsets = [0, 0], sizes = [1, 128], strides = [1, 1]} : vector<8x128xbf16> to vector<1x128xbf16>
    %9 = vector.broadcast %8 : vector<1x128xbf16> to vector<16x128xbf16>
    %10 = arith.addf %6, %9 : vector<16x128xbf16>
    %11 = math.tanh %10 : vector<16x128xbf16>
    %12 = arith.extf %11 : vector<16x128xbf16> to vector<16x128xf32>
    %13 = vector.extract_strided_slice %7 {offsets = [1, 0], sizes = [1, 128], strides = [1, 1]} : vector<8x128xbf16> to vector<1x128xbf16>
    %14 = vector.broadcast %13 : vector<1x128xbf16> to vector<16x128xbf16>
    %15 = arith.addf %6, %14 : vector<16x128xbf16>
    %16 = math.tanh %15 : vector<16x128xbf16>
    %17 = arith.extf %16 : vector<16x128xbf16> to vector<16x128xf32>
    %18 = arith.addf %12, %17 : vector<16x128xf32>
    %19 = vector.extract_strided_slice %7 {offsets = [2, 0], sizes = [1, 128], strides = [1, 1]} : vector<8x128xbf16> to vector<1x128xbf16>
    %20 = vector.broadcast %19 : vector<1x128xbf16> to vector<16x128xbf16>
    %21 = arith.addf %6, %20 : vector<16x128xbf16>
    %22 = math.tanh %21 : vector<16x128xbf16>
    %23 = arith.extf %22 : vector<16x128xbf16> to vector<16x128xf32>
    %24 = arith.addf %18, %23 : vector<16x128xf32>
    %25 = vector.extract_strided_slice %7 {offsets = [3, 0], sizes = [1, 128], strides = [1, 1]} : vector<8x128xbf16> to vector<1x128xbf16>
    %26 = vector.broadcast %25 : vector<1x128xbf16> to vector<16x128xbf16>
    %27 = arith.addf %6, %26 : vector<16x128xbf16>
    %28 = math.tanh %27 : vector<16x128xbf16>
    %29 = arith.extf %28 : vector<16x128xbf16> to vector<16x128xf32>
    %30 = arith.addf %24, %29 : vector<16x128xf32>
    %31 = vector.extract_strided_slice %7 {offsets = [4, 0], sizes = [1, 128], strides = [1, 1]} : vector<8x128xbf16> to vector<1x128xbf16>
    %32 = vector.broadcast %31 : vector<1x128xbf16> to vector<16x128xbf16>
    %33 = arith.addf %6, %32 : vector<16x128xbf16>
    %34 = math.tanh %33 : vector<16x128xbf16>
    %35 = arith.extf %34 : vector<16x128xbf16> to vector<16x128xf32>
    %36 = arith.addf %30, %35 : vector<16x128xf32>
    %37 = vector.extract_strided_slice %7 {offsets = [5, 0], sizes = [1, 128], strides = [1, 1]} : vector<8x128xbf16> to vector<1x128xbf16>
    %38 = vector.broadcast %37 : vector<1x128xbf16> to vector<16x128xbf16>
    %39 = arith.addf %6, %38 : vector<16x128xbf16>
    %40 = math.tanh %39 : vector<16x128xbf16>
    %41 = arith.extf %40 : vector<16x128xbf16> to vector<16x128xf32>
    %42 = arith.addf %36, %41 : vector<16x128xf32>
    %43 = vector.extract_strided_slice %7 {offsets = [6, 0], sizes = [1, 128], strides = [1, 1]} : vector<8x128xbf16> to vector<1x128xbf16>
    %44 = vector.broadcast %43 : vector<1x128xbf16> to vector<16x128xbf16>
    %45 = arith.addf %6, %44 : vector<16x128xbf16>
    %46 = math.tanh %45 : vector<16x128xbf16>
    %47 = arith.extf %46 : vector<16x128xbf16> to vector<16x128xf32>
    %48 = arith.addf %42, %47 : vector<16x128xf32>
    %49 = vector.extract_strided_slice %7 {offsets = [7, 0], sizes = [1, 128], strides = [1, 1]} : vector<8x128xbf16> to vector<1x128xbf16>
    %50 = vector.broadcast %49 : vector<1x128xbf16> to vector<16x128xbf16>
    %51 = arith.addf %6, %50 : vector<16x128xbf16>
    %52 = math.tanh %51 : vector<16x128xbf16>
    %53 = arith.extf %52 : vector<16x128xbf16> to vector<16x128xf32>
    %54 = arith.addf %48, %53 : vector<16x128xf32>
    %cst_7 = arith.constant 1.250000e-01 : f32
    %55 = vector.broadcast %cst_7 : f32 to vector<16x128xf32>
    %56 = arith.mulf %54, %55 : vector<16x128xf32>
    %57 = arith.truncf %56 : vector<16x128xf32> to vector<16x128xbf16>
    %c0_8 = arith.constant 0 : index
    %c0_9 = arith.constant 0 : index
    %58 = vector.load %arg6[%c0_8, %c0_9] : memref<128x4xbf16, #tpu.memory_space<vmem>>, vector<128x4xbf16>
    %cst_10 = arith.constant dense<0.000000e+00> : vector<16x4xf32>
    %59 = tpu.matmul %57, %58, %cst_10 {dimension_numbers = #tpu.dot_dimension_numbers<[1], [0], [0], [1], [0, 0, 1, 1], [], []>} : vector<16x128xbf16>, vector<128x4xbf16>, vector<16x4xf32> -> vector<16x4xf32>
    %c0_11 = arith.constant 0 : index
    %c0_12 = arith.constant 0 : index
    %60 = vector.load %arg7[%c0_11, %c0_12] : memref<1x4xf32, #tpu.memory_space<vmem>>, vector<1x4xf32>
    %61 = vector.broadcast %60 : vector<1x4xf32> to vector<16x4xf32>
    %62 = arith.addf %59, %61 : vector<16x4xf32>
    %63 = arith.truncf %62 : vector<16x4xf32> to vector<16x4xbf16>
    %64 = arith.extf %63 : vector<16x4xbf16> to vector<16x4xf32>
    %c0_13 = arith.constant 0 : index
    %c0_14 = arith.constant 0 : index
    %65 = vector.load %arg2[%c0_13, %c0_14] : memref<16x4xf32, #tpu.memory_space<vmem>>, vector<16x4xf32>
    %cst_15 = arith.constant 1.000000e-01 : f32
    %66 = vector.broadcast %cst_15 : f32 to vector<16x4xf32>
    %67 = arith.mulf %66, %65 : vector<16x4xf32>
    %68 = arith.addf %64, %67 : vector<16x4xf32>
    %69 = arith.mulf %65, %65 : vector<16x4xf32>
    %cst_16 = arith.constant dense<0.000000e+00> : vector<16xf32>
    %70 = vector.multi_reduction <add>, %69, %cst_16 [1] : vector<16x4xf32> to vector<16xf32>
    %71 = vector.shape_cast %70 : vector<16xf32> to vector<16x1xf32>
    %cst_17 = arith.constant -5.000000e-01 : f32
    %72 = vector.broadcast %cst_17 : f32 to vector<16x1xf32>
    %73 = arith.mulf %72, %71 : vector<16x1xf32>
    %cst_18 = arith.constant -5.53458643 : f32
    %74 = vector.broadcast %cst_18 : f32 to vector<16x1xf32>
    %75 = arith.subf %73, %74 : vector<16x1xf32>
    %c0_19 = arith.constant 0 : index
    %c0_20 = arith.constant 0 : index
    %76 = vector.load %arg8[%c0_19, %c0_20] : memref<128x256xbf16, #tpu.memory_space<vmem>>, vector<128x256xbf16>
    %cst_21 = arith.constant dense<0.000000e+00> : vector<16x256xf32>
    %77 = tpu.matmul %57, %76, %cst_21 {dimension_numbers = #tpu.dot_dimension_numbers<[1], [0], [0], [1], [0, 0, 1, 1], [], []>} : vector<16x128xbf16>, vector<128x256xbf16>, vector<16x256xf32> -> vector<16x256xf32>
    %c0_22 = arith.constant 0 : index
    %c0_23 = arith.constant 0 : index
    %78 = vector.load %arg9[%c0_22, %c0_23] : memref<1x256xf32, #tpu.memory_space<vmem>>, vector<1x256xf32>
    %79 = vector.broadcast %78 : vector<1x256xf32> to vector<16x256xf32>
    %80 = arith.addf %77, %79 : vector<16x256xf32>
    %cst_24 = arith.constant 0.000000e+00 : f32
    %81 = vector.broadcast %cst_24 : f32 to vector<16x256xf32>
    %82 = arith.maximumf %80, %81 : vector<16x256xf32>
    %83 = arith.truncf %82 : vector<16x256xf32> to vector<16x256xbf16>
    %c0_25 = arith.constant 0 : index
    %c0_26 = arith.constant 0 : index
    %84 = vector.load %arg10[%c0_25, %c0_26] : memref<256x256xbf16, #tpu.memory_space<vmem>>, vector<256x256xbf16>
    %cst_27 = arith.constant dense<0.000000e+00> : vector<16x256xf32>
    %85 = tpu.matmul %83, %84, %cst_27 {dimension_numbers = #tpu.dot_dimension_numbers<[1], [0], [0], [1], [0, 0, 1, 1], [], []>} : vector<16x256xbf16>, vector<256x256xbf16>, vector<16x256xf32> -> vector<16x256xf32>
    %c0_28 = arith.constant 0 : index
    %c0_29 = arith.constant 0 : index
    %86 = vector.load %arg11[%c0_28, %c0_29] : memref<1x256xf32, #tpu.memory_space<vmem>>, vector<1x256xf32>
    %87 = vector.broadcast %86 : vector<1x256xf32> to vector<16x256xf32>
    %88 = arith.addf %85, %87 : vector<16x256xf32>
    %cst_30 = arith.constant 0.000000e+00 : f32
    %89 = vector.broadcast %cst_30 : f32 to vector<16x256xf32>
    %90 = arith.maximumf %88, %89 : vector<16x256xf32>
    %c0_31 = arith.constant 0 : index
    %c0_32 = arith.constant 0 : index
    %91 = vector.load %arg12[%c0_31, %c0_32] : memref<1x256xf32, #tpu.memory_space<vmem>>, vector<1x256xf32>
    %92 = vector.broadcast %91 : vector<1x256xf32> to vector<16x256xf32>
    %93 = arith.mulf %90, %92 : vector<16x256xf32>
    %cst_33 = arith.constant dense<0.000000e+00> : vector<16xf32>
    %94 = vector.multi_reduction <add>, %93, %cst_33 [1] : vector<16x256xf32> to vector<16xf32>
    %95 = vector.shape_cast %94 : vector<16xf32> to vector<16x1xf32>
    %c0_34 = arith.constant 0 : index
    %c0_35 = arith.constant 0 : index
    %96 = vector.load %arg13[%c0_34, %c0_35] : memref<1x1xf32, #tpu.memory_space<vmem>>, vector<1x1xf32>
    %97 = vector.broadcast %96 : vector<1x1xf32> to vector<16x1xf32>
    %98 = arith.addf %95, %97 : vector<16x1xf32>
    %c0_36 = arith.constant 0 : index
    %c0_37 = arith.constant 0 : index
    %99 = vector.load %arg14[%c0_36, %c0_37] : memref<16x8xf32, #tpu.memory_space<vmem>>, vector<16x4xf32>
    tpu.vector_store %arg14[%c0_36, %c0_37], %68 {strides = array<i32>} : memref<16x8xf32, #tpu.memory_space<vmem>>, vector<16x4xf32>,
    %c0_38 = arith.constant 0 : index
    %c4 = arith.constant 4 : index
    %100 = vector.load %arg14[%c0_38, %c4] : memref<16x8xf32, #tpu.memory_space<vmem>>, vector<16x1xf32>
    tpu.vector_store %arg14[%c0_38, %c4], %75 {strides = array<i32>} : memref<16x8xf32, #tpu.memory_space<vmem>>, vector<16x1xf32>,
    %c0_39 = arith.constant 0 : index
    %c5 = arith.constant 5 : index
    %101 = vector.load %arg14[%c0_39, %c5] : memref<16x8xf32, #tpu.memory_space<vmem>>, vector<16x1xf32>
    tpu.vector_store %arg14[%c0_39, %c5], %98 {strides = array<i32>} : memref<16x8xf32, #tpu.memory_space<vmem>>, vector<16x1xf32>,
    return
  }
  func.func @transform_0(%arg0: i32) -> (i32, i32) {
    %c0_i32 = arith.constant 0 : i32
    %c0_i32_0 = arith.constant 0 : i32
    return %arg0, %c0_i32 : i32, i32
  }
  func.func @transform_1(%arg0: i32) -> (i32, i32) {
    %c0_i32 = arith.constant 0 : i32
    %c0_i32_0 = arith.constant 0 : i32
    return %arg0, %c0_i32 : i32, i32
  }
  func.func @transform_2(%arg0: i32) -> (i32, i32) {
    %c0_i32 = arith.constant 0 : i32
    %c0_i32_0 = arith.constant 0 : i32
    %c0_i32_1 = arith.constant 0 : i32
    return %c0_i32, %c0_i32_0 : i32, i32
  }
  func.func @transform_3(%arg0: i32) -> (i32, i32) {
    %c0_i32 = arith.constant 0 : i32
    %c0_i32_0 = arith.constant 0 : i32
    %c0_i32_1 = arith.constant 0 : i32
    return %c0_i32, %c0_i32_0 : i32, i32
  }
  func.func @transform_4(%arg0: i32) -> (i32, i32) {
    %c0_i32 = arith.constant 0 : i32
    %c0_i32_0 = arith.constant 0 : i32
    %c0_i32_1 = arith.constant 0 : i32
    return %c0_i32, %c0_i32_0 : i32, i32
  }
  func.func @transform_5(%arg0: i32) -> (i32, i32) {
    %c0_i32 = arith.constant 0 : i32
    %c0_i32_0 = arith.constant 0 : i32
    %c0_i32_1 = arith.constant 0 : i32
    return %c0_i32, %c0_i32_0 : i32, i32
  }
  func.func @transform_6(%arg0: i32) -> (i32, i32) {
    %c0_i32 = arith.constant 0 : i32
    %c0_i32_0 = arith.constant 0 : i32
    %c0_i32_1 = arith.constant 0 : i32
    return %c0_i32, %c0_i32_0 : i32, i32
  }
  func.func @transform_7(%arg0: i32) -> (i32, i32) {
    %c0_i32 = arith.constant 0 : i32
    %c0_i32_0 = arith.constant 0 : i32
    %c0_i32_1 = arith.constant 0 : i32
    return %c0_i32, %c0_i32_0 : i32, i32
  }
  func.func @transform_8(%arg0: i32) -> (i32, i32) {
    %c0_i32 = arith.constant 0 : i32
    %c0_i32_0 = arith.constant 0 : i32
    %c0_i32_1 = arith.constant 0 : i32
    return %c0_i32, %c0_i32_0 : i32, i32
  }
  func.func @transform_9(%arg0: i32) -> (i32, i32) {
    %c0_i32 = arith.constant 0 : i32
    %c0_i32_0 = arith.constant 0 : i32
    %c0_i32_1 = arith.constant 0 : i32
    return %c0_i32, %c0_i32_0 : i32, i32
  }
  func.func @transform_10(%arg0: i32) -> (i32, i32) {
    %c0_i32 = arith.constant 0 : i32
    %c0_i32_0 = arith.constant 0 : i32
    %c0_i32_1 = arith.constant 0 : i32
    return %c0_i32, %c0_i32_0 : i32, i32
  }
  func.func @transform_11(%arg0: i32) -> (i32, i32) {
    %c0_i32 = arith.constant 0 : i32
    %c0_i32_0 = arith.constant 0 : i32
    %c0_i32_1 = arith.constant 0 : i32
    return %c0_i32, %c0_i32_0 : i32, i32
  }
  func.func @transform_12(%arg0: i32) -> (i32, i32) {
    %c0_i32 = arith.constant 0 : i32
    %c0_i32_0 = arith.constant 0 : i32
    %c0_i32_1 = arith.constant 0 : i32
    return %c0_i32, %c0_i32_0 : i32, i32
  }
  func.func @transform_13(%arg0: i32) -> (i32, i32) {
    %c0_i32 = arith.constant 0 : i32
    %c0_i32_0 = arith.constant 0 : i32
    return %arg0, %c0_i32 : i32, i32
  }
}

</mosaic_0001>

<bundles_post_ra>
// kernel: tpu_custom_call.1
= control target key start
LH: loop header
LB: loop body
LE: loop exit
PB: predicated region body
PF: predicated region fallthrough
CT: control target
= control target key end

     0   :  { %s1292_s0 = inlined_call_operand.vmem [shape: bf16[16,32], index: 0, kind: input, shape index: {}]   ;;  %s1293_s1 = inlined_call_operand.vmem [shape: f32[16,4], index: 1, kind: input, shape index: {}]   ;;  %s1294_s2 = inlined_call_operand.vmem [shape: bf16[32,128], index: 2, kind: input, shape index: {}]   ;;  %s1295_s3 = inlined_call_operand.vmem [shape: f32[1,128], index: 3, kind: input, shape index: {}]   ;;  %s1296_s4 = inlined_call_operand.vmem [shape: bf16[8,128], index: 4, kind: input, shape index: {}]   ;;  %s1297_s5 = inlined_call_operand.vmem [shape: bf16[128,4], index: 5, kind: input, shape index: {}]   ;;  %s1298_s6 = inlined_call_operand.vmem [shape: f32[1,4], index: 6, kind: input, shape index: {}]   ;;  %s1299_s7 = inlined_call_operand.hbm [shape: bf16[128,256], index: 7, kind: input, shape index: {}]   ;;  %s1300_s8 = inlined_call_operand.vmem [shape: f32[1,256], index: 8, kind: input, shape index: {}]   ;;  %s1301_s9 = inlined_call_operand.hbm [shape: bf16[256,256], index: 9, kind: input, shape index: {}]   ;;  %s1302_s10 = inlined_call_operand.vmem [shape: f32[1,256], index: 10, kind: input, shape index: {}]   ;;  %s1303_s11 = inlined_call_operand.vmem [shape: f32[1,256], index: 11, kind: input, shape index: {}]   ;;  %s1304_s12 = inlined_call_operand.<no memory space> [shape: f32[1,1], index: 12, kind: input, shape index: {}]   ;;  %s1305_s13 = inlined_call_operand.vmem [shape: f32[16,8], index: 13, kind: output, shape index: {}]  }
   0x1   :  { %v18_v0 = vstv %s1304_s12 }
   0x2   :  { %19 = vst [vmem:[#allocation2] sm:$0x1] %v18_v0 }
   0x3   :  { %20 = vsyncpa [#allocation4], 0 }
   0x4   :  { %21 = vsyncpa [#allocation6], 0  ;;  %s1094_s27 = smov [#allocation3]   ;;  %s1046_s14 = scalar_lea.hbm %s1299_s7, 2048 }
   0x5   :  { %s41_s28 = sshll.u32 %s1094_s27, 4  ;;  %p1047_p0 = scmp.ne.s32.totalorder %s1299_s7, %s1046_s14  ;;  %s42_s28 = int_to_ptr.vmem [resolvable:$true] %s41_s28 }
   0x6   :  { %p1050_p1 = scmp.lt.u32.totalorder %s1046_s14, %s1299_s7 }
   0x8   :  { %p1052_p2 = pnand %p1050_p1, %p1047_p0 }
   0xa   :  { %1055 = shalt.err (!%p1052_p2)
}
   0xb   :  { %s1056_s12 = scalar_lea.vmem %s42_s28, 2048  ;;  %p1061_p4 = scmp.lt.s32.totalorder %s42_s28, %s42_s28 }
   0xc   :  { %p1057_p3 = scmp.ne.s32.totalorder %s42_s28, %s1056_s12  ;;  %p1062_p5 = scmp.lt.s32.totalorder %s1056_s12, %s1056_s12 }
   0xe   :  { %p1063_p6 = por %p1062_p5, %p1061_p4 }
  0x10   :  { %p1064_p7 = pnand %p1063_p6, %p1057_p3 }
  0x12   :  { %1067 = shalt.err (!%p1064_p7)
}
  0x13   :  { %s1095_s19 = smov 128   ;;  %s1096_s20 = smov 8  }
  0x14   :  { %47 = dma.hbm_to_vmem [thread:$0]  %s1299_s7, 2048, %s42_s28, [#allocation4], %s1095_s19, %s1095_s19, %s1096_s20  }
  0x15   :  { %s1097_s23 = smov [#allocation5]   ;;  %s1068_s27 = scalar_lea.hbm %s1301_s9, 4096 }
  0x16   :  { %s55_s24 = sshll.u32 %s1097_s23, 4  ;;  %p1069_p8 = scmp.ne.s32.totalorder %s1301_s9, %s1068_s27  ;;  %s56_s24 = int_to_ptr.vmem [resolvable:$true] %s55_s24 }
  0x17   :  { %p1072_p9 = scmp.lt.u32.totalorder %s1068_s27, %s1301_s9 }
  0x19   :  { %p1074_p10 = pnand %p1072_p9, %p1069_p8 }
  0x1b   :  { %1077 = shalt.err (!%p1074_p10)
}
  0x1c   :  { %s1078_s16 = scalar_lea.vmem %s56_s24, 4096  ;;  %p1083_p12 = scmp.lt.s32.totalorder %s56_s24, %s56_s24 }
  0x1d   :  { %p1079_p11 = scmp.ne.s32.totalorder %s56_s24, %s1078_s16  ;;  %p1084_p13 = scmp.lt.s32.totalorder %s1078_s16, %s1078_s16 }
  0x1f   :  { %p1085_p0 = por %p1084_p13, %p1083_p12 }
  0x21   :  { %p1086_p1 = pnand %p1085_p0, %p1079_p11 }
  0x23   :  { %1089 = shalt.err (!%p1086_p1)
}
  0x24   :  { %61 = dma.hbm_to_vmem [thread:$0]  %s1301_s9, 4096, %s56_s24, [#allocation6], %s1095_s19, %s1095_s19, %s1096_s20  }
  0x25   :  { %1090 = dma.done.wait [#allocation4], 2048  }
  0x26   :  { %1091 = vsyncadd [#allocation4], 4294965248 }
  0x27   :  { %1092 = dma.done.wait [#allocation6], 4096  }
  0x28   :  { %1093 = vsyncadd [#allocation6], 4294963200  ;;  %v1098_v1 = vmov 0.0   ;;  %vm1099_vm0 = vmmov 0   ;;  %v947_v2 = vld [vmem:[%s1294_s2] sm:$0xff]   ;;  %v948_v3 = vld [vmem:[%s1294_s2 + $0x8] sm:$0xff]   ;;  %v155_v26 = vlaneseq }
  0x29   :  { %911 = vmatprep.subr.bf16.mxu0 %v1098_v1  ;;  %915 = vmatprep.mubr.msk.bf16.mxu0 %vm1099_vm0, %v1098_v1  ;;  %v949_v4 = vld [vmem:[%s1292_s0] sm:$0xff]   ;;  %vm105_vm1 = vcmask 261120   ;;  %v951_v6 = vld [vmem:[%s1297_s5 + $0x8] sm:$0xff]   ;;  %v952_v7 = vld [vmem:[%s1297_s5 + $0x10] sm:$0xff]   ;;  %vm362_vm2 = vcmask 31744   ;;  %vm814_vm3 = vcmask 39968  }
  0x2a   :  { %912 = vmatpush3.bf16.msra.mxu0 %v947_v2  ;;  %v950_v5 = vld [vmem:[%s1297_s5] sm:$0xff]   ;;  %v953_v8 = vld [vmem:[%s1297_s5 + $0x18] sm:$0xff]   ;;  %v955_v10 = vld [vmem:[%s1297_s5 + $0x28] sm:$0xff]   ;;  %v156_v28 = vshrl.u32 %v155_v26, 7  ;;  %s1101_s30 = smov 5   ;;  %vm825_vm4 = vcmask 48168  }
  0x2b   :  { %913 = vmatprep.subr.bf16.mxu0 %v1098_v1  ;;  %v954_v9 = vld [vmem:[%s1297_s5 + $0x20] sm:$0xff]   ;;  %v956_v11 = vld [vmem:[%s1297_s5 + $0x30] sm:$0xff]   ;;  %v957_v12 = vld [vmem:[%s1297_s5 + $0x38] sm:$0xff]  }
  0x2c   :  { %v960_v13 = vld [vmem:[#allocation3 + $0x4] ss:$8 sps:$4 sm:$0xff]   ;;  %v984_v15 = vld [vmem:[#allocation5] ss:$8 sps:$4 sm:$0xff]   ;;  %v985_v16 = vld [vmem:[#allocation5 + $0x14] ss:$8 sps:$4 sm:$0xff]  }
  0x2d   :  { %v982_v14 = vld [vmem:[#allocation5 + $0x4] ss:$8 sps:$4 sm:$0xff]   ;;  %v987_v17 = vld [vmem:[#allocation5 + $0x10] ss:$8 sps:$4 sm:$0xff]   ;;  %v990_v19 = vld [vmem:[#allocation5 + $0x20] ss:$8 sps:$4 sm:$0xff]  }
  0x2e   :  { %914 = vmatpush3.bf16.msra.mxu0 %v948_v3  ;;  %734 = vmatprep.subr.bf16.mxu1 %v982_v14  ;;  %v988_v18 = vld [vmem:[#allocation5 + $0x24] ss:$8 sps:$4 sm:$0xff]   ;;  %v991_v20 = vld [vmem:[#allocation5 + $0x34] ss:$8 sps:$4 sm:$0xff]   ;;  %v993_v21 = vld [vmem:[#allocation5 + $0x30] ss:$8 sps:$4 sm:$0xff]  }
  0x2f   :  { %919 = vmatprep.subr.bf16.mxu0 %v1098_v1  ;;  %735 = vmatpush1.bf16.msra.mxu1 %v984_v15  ;;  %v994_v22 = vld [vmem:[#allocation5 + $0x44] ss:$8 sps:$4 sm:$0xff]   ;;  %v996_v23 = vld [vmem:[#allocation5 + $0x40] ss:$8 sps:$4 sm:$0xff]   ;;  %v997_v24 = vld [vmem:[#allocation5 + $0x54] ss:$8 sps:$4 sm:$0xff]  }
  0x30   :  { %736 = vmatprep.subr.bf16.mxu1 %v985_v16  ;;  %v999_v25 = vld [vmem:[#allocation5 + $0x50] ss:$8 sps:$4 sm:$0xff]   ;;  %v151_v27 = vld [vmem:[%s1296_s4] sm:$0xf]  ;;  %v1235_v31 = vsub.s32 0, %v156_v28  ;;  %v1237_v33 = vsub.s32 1, %v156_v28 }
  0x31   :  { %916 = vmatmul.mubr.msk.bf16.vlgmr.msra.gmra.mrb[0].mxu0 %vm105_vm1, %v949_v4  ;;  %v163_v29 = vshrl.u32 %v151_v27, 16  ;;  %v153_v30 = vpack.i.b16 %v151_v27, %v151_v27  ;;  %v834_v34 = vld [vmem:[%s1295_s3] ss:$0 sm:$0xff]  ;;  %v198_v39 = vsub.s32 2, %v156_v28  ;;  %v218_v48 = vsub.s32 3, %v156_v28 }
  0x32   :  { %935 = vmatprep.mubr.msk.bf16.mxu0 %vm1099_vm0, %v1098_v1  ;;  %920 = vmatpush3.bf16.msra.mxu0 %v950_v5 }
  0x33   :  { %921 = vmatprep.subr.bf16.mxu0 %v1098_v1  ;;  %737 = vmatpush1.bf16.msra.mxu1 %v987_v17  ;;  %v164_v32 = vpack.i.b16 %v163_v29, %v163_v29  ;;  %v158_v38 = vrot.slane %v153_v30, %v1235_v31  ;;  %v179_v44 = vrot.slane %v153_v30, %v1237_v33 }
  0x34   :  { %738 = vmatprep.subr.bf16.mxu1 %v988_v18  ;;  %v199_v47 = vrot.slane %v153_v30, %v198_v39  ;;  %v219_v55 = vrot.slane %v153_v30, %v218_v48 }
  0x35   :  { %v169_v42 = vrot.slane %v164_v32, %v1235_v31  ;;  %v189_v45 = vrot.slane %v164_v32, %v1237_v33  ;;  %v209_v53 = vrot.slane %v164_v32, %v198_v39  ;;  %v229_v57 = vrot.slane %v164_v32, %v218_v48  ;;  %v970_v48 = vld [vmem:[#allocation3 + $0x40] ss:$8 sps:$4 sm:$0xff]  }
  0x36   :  { %922 = vmatpush3.bf16.msra.mxu0 %v951_v6 }
  0x37   :  { %923 = vmatprep.subr.bf16.mxu0 %v1098_v1  ;;  %739 = vmatpush1.bf16.msra.mxu1 %v990_v19 }
  0x38   :  { %740 = vmatprep.subr.bf16.mxu1 %v991_v20 }
  0x3a   :  { %924 = vmatpush3.bf16.msra.mxu0 %v952_v7 }
  0x3b   :  { %925 = vmatprep.subr.bf16.mxu0 %v1098_v1  ;;  %741 = vmatpush1.bf16.msra.mxu1 %v993_v21 }
  0x3c   :  { %742 = vmatprep.subr.bf16.mxu1 %v994_v22 }
  0x3e   :  { %926 = vmatpush3.bf16.msra.mxu0 %v953_v8 }
  0x3f   :  { %927 = vmatprep.subr.bf16.mxu0 %v1098_v1  ;;  %743 = vmatpush1.bf16.msra.mxu1 %v996_v23 }
  0x40   :  { %744 = vmatprep.subr.bf16.mxu1 %v997_v24 }
  0x42   :  { %928 = vmatpush3.bf16.msra.mxu0 %v954_v9 }
  0x43   :  { %929 = vmatprep.subr.bf16.mxu0 %v1098_v1  ;;  %745 = vmatpush1.bf16.msra.mxu1 %v999_v25 }
  0x46   :  { %930 = vmatpush3.bf16.msra.mxu0 %v955_v10 }
  0x47   :  { %931 = vmatprep.subr.bf16.mxu0 %v1098_v1 }
  0x4a   :  { %932 = vmatpush3.bf16.msra.mxu0 %v956_v11 }
  0x4b   :  { %933 = vmatprep.subr.bf16.mxu0 %v1098_v1 }
  0x4e   :  { %934 = vmatpush3.bf16.msra.mxu0 %v957_v12 }
  0x4f   :  { %481 = vmatprep.subr.bf16.mxu0 %v960_v13 }
 0x104   :  { %v143_v35 = vpop.f32.mrb[0].mxu0 }
 0x105   :  { %v917_v36 = vpop.f32.mrb[1].mxu0  ;;  %v144_v40 = vadd.f32 %v834_v34, %v143_v35 }
 0x106   :  { %v146_v37 = vpop.f32.mrb[2].mxu0 }
 0x107   :  { %v147_v41 = vadd.f32 %v834_v34, %v146_v37  ;;  %v918_v43 = vpop.f32.mrb[3].mxu0 }
 0x108   :  { %v966_v43 = vld [vmem:[#allocation3 + $0x24] ss:$8 sps:$4 sm:$0xff]  }
 0x109   :  { %v150_v46 = vpack.c.bf16 %v147_v41, %v144_v40  ;;  %v963_v40 = vld [vmem:[#allocation3 + $0x14] ss:$8 sps:$4 sm:$0xff]   ;;  %v961_v41 = vld [vmem:[#allocation3 + $0x10] ss:$8 sps:$4 sm:$0xff]  }
 0x10b   :  { %v159_v49 = vadd.bf16 %v158_v38, %v150_v46  ;;  %v170_v50 = vadd.bf16 %v169_v42, %v150_v46  ;;  %v180_v51 = vadd.bf16 %v179_v44, %v150_v46  ;;  %v190_v52 = vadd.bf16 %v189_v45, %v150_v46  ;;  %v958_v38 = vld [vmem:[#allocation3] ss:$8 sps:$4 sm:$0xff]   ;;  %v969_v45 = vld [vmem:[#allocation3 + $0x34] ss:$8 sps:$4 sm:$0xff]  }
 0x10c   :  { %v200_v54 = vadd.bf16 %v199_v47, %v150_v46  ;;  %v210_v56 = vadd.bf16 %v209_v53, %v150_v46  ;;  %v220_v58 = vadd.bf16 %v219_v55, %v150_v46  ;;  %v230_v59 = vadd.bf16 %v229_v57, %v150_v46  ;;  %v964_v44 = vld [vmem:[#allocation3 + $0x20] ss:$8 sps:$4 sm:$0xff]   ;;  %v967_v46 = vld [vmem:[#allocation3 + $0x30] ss:$8 sps:$4 sm:$0xff]   ;;  %v972_v47 = vld [vmem:[#allocation3 + $0x44] ss:$8 sps:$4 sm:$0xff]  }
 0x10d   :  { %1030 = vtanh.bf16 %v159_v49  ;;  %v1100_v42 = vmov 0   ;;  %v975_v49 = vld [vmem:[#allocation3 + $0x54] ss:$8 sps:$4 sm:$0xff]   ;;  %v1000_v55 = vld [vmem:[#allocation5 + $0x64] ss:$8 sps:$4 sm:$0xff]  }
 0x10e   :  { %1032 = vtanh.bf16 %v170_v50  ;;  %v973_v50 = vld [vmem:[#allocation3 + $0x50] ss:$8 sps:$4 sm:$0xff]   ;;  %v981_v53 = vld [vmem:[#allocation3 + $0x74] ss:$8 sps:$4 sm:$0xff]   ;;  %746 = vmatprep.subr.bf16.mxu1 %v1000_v55 }
 0x10f   :  { %1034 = vtanh.bf16 %v180_v51  ;;  %v978_v51 = vld [vmem:[#allocation3 + $0x64] ss:$8 sps:$4 sm:$0xff]   ;;  %v1003_v57 = vld [vmem:[#allocation5 + $0x74] ss:$8 sps:$4 sm:$0xff]  }
 0x110   :  { %1036 = vtanh.bf16 %v190_v52  ;;  %v976_v52 = vld [vmem:[#allocation3 + $0x60] ss:$8 sps:$4 sm:$0xff]  }
 0x111   :  { %1038 = vtanh.bf16 %v200_v54  ;;  %v979_v54 = vld [vmem:[#allocation3 + $0x70] ss:$8 sps:$4 sm:$0xff]  }
 0x112   :  { %1040 = vtanh.bf16 %v210_v56  ;;  %v1002_v56 = vld [vmem:[#allocation5 + $0x60] ss:$8 sps:$4 sm:$0xff]  }
 0x113   :  { %1042 = vtanh.bf16 %v220_v58  ;;  %747 = vmatpush1.bf16.msra.mxu1 %v1002_v56  ;;  %v1005_v58 = vld [vmem:[#allocation5 + $0x70] ss:$8 sps:$4 sm:$0xff]  }
 0x114   :  { %1044 = vtanh.bf16 %v230_v59  ;;  %748 = vmatprep.subr.bf16.mxu1 %v1003_v57  ;;  %v1006_v59 = vld [vmem:[#allocation5 + $0x84] ss:$8 sps:$4 sm:$0xff]  }
 0x117   :  { %749 = vmatpush1.bf16.msra.mxu1 %v1005_v58 }
 0x118   :  { %v1031_v60 = vpop.eup %1030  ;;  %750 = vmatprep.subr.bf16.mxu1 %v1006_v59 }
 0x119   :  { %v1033_v61 = vpop.eup %1032  ;;  %v161_v62 = vunpack.c.l.bf16 %v1031_v60  ;;  %v162_v63 = vunpack.c.h.bf16 %v1031_v60  ;;  %v1008_v60 = vld [vmem:[#allocation5 + $0x80] ss:$8 sps:$4 sm:$0xff]  }
 0x11a   :  { %v1035_v0 = vpop.eup %1034  ;;  %v172_v1 = vunpack.c.l.bf16 %v1033_v61  ;;  %v173_v2 = vunpack.c.h.bf16 %v1033_v61  ;;  %v1009_v61 = vld [vmem:[#allocation5 + $0x94] ss:$8 sps:$4 sm:$0xff]  }
 0x11b   :  { %v1037_v3 = vpop.eup %1036  ;;  %v182_v6 = vunpack.c.l.bf16 %v1035_v0  ;;  %v183_v7 = vunpack.c.h.bf16 %v1035_v0  ;;  %751 = vmatpush1.bf16.msra.mxu1 %v1008_v60  ;;  %v1014_v0 = vld [vmem:[#allocation5 + $0xa0] ss:$8 sps:$4 sm:$0xff]  }
 0x11c   :  { %v174_v4 = vadd.f32 %v172_v1, %v161_v62  ;;  %v175_v5 = vadd.f32 %v173_v2, %v162_v63  ;;  %v1039_v8 = vpop.eup %1038  ;;  %v192_v11 = vunpack.c.l.bf16 %v1037_v3  ;;  %v193_v12 = vunpack.c.h.bf16 %v1037_v3  ;;  %v1011_v62 = vld [vmem:[#allocation5 + $0x90] ss:$8 sps:$4 sm:$0xff]   ;;  %752 = vmatprep.subr.bf16.mxu1 %v1009_v61  ;;  %v1012_v63 = vld [vmem:[#allocation5 + $0xa4] ss:$8 sps:$4 sm:$0xff]   ;;  %v1015_v1 = vld [vmem:[#allocation5 + $0xb4] ss:$8 sps:$4 sm:$0xff]  }
 0x11d   :  { %v1041_v13 = vpop.eup %1040  ;;  %v202_v16 = vunpack.c.l.bf16 %v1039_v8  ;;  %v203_v17 = vunpack.c.h.bf16 %v1039_v8  ;;  %v1017_v2 = vld [vmem:[#allocation5 + $0xb0] ss:$8 sps:$4 sm:$0xff]   ;;  %v1018_v3 = vld [vmem:[#allocation5 + $0xc4] ss:$8 sps:$4 sm:$0xff]   ;;  %v1026_v8 = vld [vmem:[#allocation5 + $0xe0] ss:$8 sps:$4 sm:$0xff]  }
 0x11e   :  { %v184_v9 = vadd.f32 %v182_v6, %v174_v4  ;;  %v185_v10 = vadd.f32 %v183_v7, %v175_v5  ;;  %v1043_v18 = vpop.eup %1042  ;;  %v212_v21 = vunpack.c.l.bf16 %v1041_v13  ;;  %v213_v22 = vunpack.c.h.bf16 %v1041_v13  ;;  %v1020_v4 = vld [vmem:[#allocation5 + $0xc0] ss:$8 sps:$4 sm:$0xff]   ;;  %v1021_v5 = vld [vmem:[#allocation5 + $0xd4] ss:$8 sps:$4 sm:$0xff]   ;;  %v1023_v6 = vld [vmem:[#allocation5 + $0xd0] ss:$8 sps:$4 sm:$0xff]  }
 0x11f   :  { %v1045_v23 = vpop.eup %1044  ;;  %v222_v26 = vunpack.c.l.bf16 %v1043_v18  ;;  %v223_v27 = vunpack.c.h.bf16 %v1043_v18  ;;  %753 = vmatpush1.bf16.msra.mxu1 %v1011_v62  ;;  %v1024_v7 = vld [vmem:[#allocation5 + $0xe4] ss:$8 sps:$4 sm:$0xff]  }
 0x120   :  { %v194_v14 = vadd.f32 %v192_v11, %v184_v9  ;;  %v195_v15 = vadd.f32 %v193_v12, %v185_v10  ;;  %v232_v30 = vunpack.c.l.bf16 %v1045_v23  ;;  %v233_v32 = vunpack.c.h.bf16 %v1045_v23  ;;  %754 = vmatprep.subr.bf16.mxu1 %v1012_v63  ;;  %v1027_v9 = vld [vmem:[#allocation5 + $0xf4] ss:$8 sps:$4 sm:$0xff]   ;;  %v1029_v10 = vld [vmem:[#allocation5 + $0xf0] ss:$8 sps:$4 sm:$0xff]  }
 0x121   :  { %v839_v11 = vld [vmem:[%s1298_s6] ss:$0 sm:$0xff] }
 0x122   :  { %v204_v19 = vadd.f32 %v202_v16, %v194_v14  ;;  %v205_v20 = vadd.f32 %v203_v17, %v195_v15  ;;  %v354_v15 = vld [vmem:[%s1293_s1] sm:$0xff]  ;;  %v355_v16 = vld [vmem:[%s1293_s1 + $0x8] sm:$0xff] }
 0x123   :  { %755 = vmatpush1.bf16.msra.mxu1 %v1014_v0 }
 0x124   :  { %v214_v24 = vadd.f32 %v212_v21, %v204_v19  ;;  %v215_v25 = vadd.f32 %v213_v22, %v205_v20  ;;  %756 = vmatprep.subr.bf16.mxu1 %v1015_v1  ;;  %v356_v21 = vmul.f32 0.1, %v354_v15  ;;  %v357_v22 = vmul.f32 0.1, %v355_v16 }
 0x126   :  { %v224_v28 = vadd.f32 %v222_v26, %v214_v24  ;;  %v225_v29 = vadd.f32 %v223_v27, %v215_v25  ;;  %v389_v27 = vld [vmem:[%s1300_s8] sm:$0x3] }
 0x127   :  { %757 = vmatpush1.bf16.msra.mxu1 %v1017_v2 }
 0x128   :  { %v234_v34 = vadd.f32 %v232_v30, %v224_v28  ;;  %v235_v35 = vadd.f32 %v233_v32, %v225_v29  ;;  %758 = vmatprep.subr.bf16.mxu1 %v1018_v3  ;;  %v394_v28 = vrot.slane %v389_v27, %v1235_v31  ;;  %v398_v29 = vrot.slane %v389_v27, %v1237_v33 }
 0x12a   :  { %v236_v36 = vmul.f32 0.125, %v234_v34  ;;  %v237_v37 = vmul.f32 0.125, %v235_v35 }
 0x12b   :  { %759 = vmatpush1.bf16.msra.mxu1 %v1020_v4 }
 0x12c   :  { %v238_v39 = vpack.c.bf16 %v237_v37, %v236_v36  ;;  %760 = vmatprep.subr.bf16.mxu1 %v1021_v5 }
 0x12e   :  { %936 = vmatmul.mubr.bf16.vlgmr.msra.gmra.mrb[4].mxu0 %v238_v39 }
 0x12f   :  { %482 = vmatpush1.bf16.msra.mxu0 %v958_v38  ;;  %513 = vmatprep.mubr.bf16.mxu0 %v1100_v42 }
 0x130   :  { %483 = vmatprep.subr.bf16.mxu0 %v963_v40  ;;  %761 = vmatpush1.bf16.msra.mxu1 %v1023_v6 }
 0x131   :  { %762 = vmatprep.subr.bf16.mxu1 %v1024_v7 }
 0x133   :  { %484 = vmatpush1.bf16.msra.mxu0 %v961_v41 }
 0x134   :  { %485 = vmatprep.subr.bf16.mxu0 %v966_v43  ;;  %763 = vmatpush1.bf16.msra.mxu1 %v1026_v8 }
 0x135   :  { %764 = vmatprep.subr.bf16.mxu1 %v1027_v9 }
 0x137   :  { %486 = vmatpush1.bf16.msra.mxu0 %v964_v44 }
 0x138   :  { %487 = vmatprep.subr.bf16.mxu0 %v969_v45  ;;  %765 = vmatpush1.bf16.msra.mxu1 %v1029_v10 }
 0x13b   :  { %488 = vmatpush1.bf16.msra.mxu0 %v967_v46  ;;  %v360_v46 = vmul.f32 %v354_v15, %v354_v15 }
 0x13c   :  { %489 = vmatprep.subr.bf16.mxu0 %v972_v47  ;;  %v361_v47 = vmul.f32 %v355_v16, %v355_v16 }
 0x13f   :  { %490 = vmatpush1.bf16.msra.mxu0 %v970_v48  ;;  %v363_v48 = vsel %vm362_vm2, %v360_v46, 0.0 }
 0x140   :  { %491 = vmatprep.subr.bf16.mxu0 %v975_v49  ;;  %364 = vadd.xlane.f32.xlu1 %v363_v48  ;;  %v366_v49 = vsel %vm362_vm2, %v361_v47, 0.0 }
 0x143   :  { %492 = vmatpush1.bf16.msra.mxu0 %v973_v50  ;;  %v562_v50 = vld [vmem:[%s1302_s10] sm:$0x3] }
 0x144   :  { %493 = vmatprep.subr.bf16.mxu0 %v978_v51  ;;  %367 = vadd.xlane.f32.xlu1 %v366_v49  ;;  %v567_v51 = vrot.slane %v562_v50, %v1235_v31 }
 0x147   :  { %494 = vmatpush1.bf16.msra.mxu0 %v976_v52  ;;  %v571_v52 = vrot.slane %v562_v50, %v1237_v33 }
 0x148   :  { %495 = vmatprep.subr.bf16.mxu0 %v981_v53  ;;  %v781_v53 = vld [vmem:[%s1303_s11] sm:$0x3] }
 0x149   :  { %v786_v57 = vrot.slane %v781_v53, %v1235_v31  ;;  %v790_v60 = vrot.slane %v781_v53, %v1237_v33 }
 0x14b   :  { %496 = vmatpush1.bf16.msra.mxu0 %v979_v54 }
 0x14e   :  { %514 = vmatmul.mubr.bf16.vlgmr.msra.gmra.mrb[8].mxu0 %v238_v39 }
 0x1cd   :  { %v365_v31 = vpop.xlane.xlu1 %364 }
 0x1ce   :  { %v369_v10 = vmul.f32 -0.5, %v365_v31 }
 0x1d1   :  { %v368_v33 = vpop.xlane.xlu1 %367 }
 0x201   :  { %v344_v12 = vpop.f32.mrb[4].mxu0 }
 0x202   :  { %v937_v13 = vpop.f32.mrb[5].mxu0  ;;  %v345_v17 = vadd.f32 %v839_v11, %v344_v12  ;;  %v370_v12 = vmul.f32 -0.5, %v368_v33 }
 0x203   :  { %v347_v14 = vpop.f32.mrb[6].mxu0 }
 0x204   :  { %v348_v18 = vadd.f32 %v839_v11, %v347_v14  ;;  %v938_v19 = vpop.f32.mrb[7].mxu0  ;;  %v848_v11 = vadd.f32 5.5345864, %v369_v10  ;;  %v849_v13 = vadd.f32 5.5345864, %v370_v12 }
 0x205   :  { %v898_v14 = vld [vmem:[#allocation2] ss:$0 sm:$0xff] }
 0x206   :  { %v351_v20 = vpack.c.bf16 %v348_v18, %v345_v17 }
 0x208   :  { %v352_v23 = vunpack.c.l.bf16 %v351_v20  ;;  %v353_v24 = vunpack.c.h.bf16 %v351_v20 }
 0x20a   :  { %v358_v25 = vadd.f32 %v356_v21, %v352_v23  ;;  %v359_v26 = vadd.f32 %v357_v22, %v353_v24 }
 0x20c   :  { %812 = vst.msk [vmem:[%s1305_s13] sm:$0xff] %vm362_vm2, %v358_v25  ;;  %813 = vst.msk [vmem:[%s1305_s13 + $0x8] sm:$0xff] %vm362_vm2, %v359_v26 }
 0x20d   :  { %815 = vst.msk [vmem:[%s1305_s13] sm:$0xff] %vm814_vm3, %v848_v11  ;;  %816 = vst.msk [vmem:[%s1305_s13 + $0x8] sm:$0xff] %vm814_vm3, %v849_v13 }
 0x221   :  { %v515_v30 = vpop.f32.mrb[8].mxu0 }
 0x222   :  { %v516_v32 = vadd.f32 %v515_v30, %v394_v28  ;;  %v517_v34 = vpop.f32.mrb[9].mxu0 }
 0x223   :  { %v518_v35 = vadd.f32 %v517_v34, %v398_v29  ;;  %v519_v36 = vpop.f32.mrb[10].mxu0 }
 0x224   :  { %v520_v37 = vadd.f32 %v519_v36, %v394_v28  ;;  %v521_v38 = vpop.f32.mrb[11].mxu0  ;;  %v524_v40 = vmax.f32 %v516_v32, 0.0 }
 0x225   :  { %v522_v39 = vadd.f32 %v521_v38, %v398_v29  ;;  %v525_v42 = vmax.f32 %v518_v35, 0.0 }
 0x226   :  { %v526_v41 = vmax.f32 %v520_v37, 0.0 }
 0x227   :  { %v527_v43 = vmax.f32 %v522_v39, 0.0 }
 0x228   :  { %v528_v44 = vpack.c.bf16 %v526_v41, %v524_v40 }
 0x229   :  { %v529_v45 = vpack.c.bf16 %v527_v43, %v525_v42 }
 0x22b   :  { %766 = vmatprep.mubr.bf16.mxu1 %v529_v45 }
 0x22c   :  { %767 = vmatmul.mubr.bf16.vlgmr.msra.gmra.mrb[0].mxu1 %v528_v44 }
 0x2ff   :  { %v768_v54 = vpop.f32.mrb[0].mxu1 }
 0x300   :  { %v769_v55 = vadd.f32 %v768_v54, %v567_v51  ;;  %v770_v56 = vpop.f32.mrb[1].mxu1 }
 0x301   :  { %v771_v58 = vadd.f32 %v770_v56, %v571_v52  ;;  %v772_v59 = vpop.f32.mrb[2].mxu1 }
 0x302   :  { %v777_v61 = vmax.f32 %v769_v55, 0.0  ;;  %v773_v62 = vadd.f32 %v772_v59, %v567_v51  ;;  %v774_v63 = vpop.f32.mrb[3].mxu1 }
 0x303   :  { %v778_v0 = vmax.f32 %v771_v58, 0.0  ;;  %v775_v1 = vadd.f32 %v774_v63, %v571_v52 }
 0x304   :  { %v779_v2 = vmax.f32 %v773_v62, 0.0  ;;  %v793_v3 = vmul.f32 %v786_v57, %v777_v61 }
 0x305   :  { %v780_v4 = vmax.f32 %v775_v1, 0.0  ;;  %v794_v5 = vmul.f32 %v790_v60, %v778_v0 }
 0x306   :  { %v795_v6 = vmul.f32 %v786_v57, %v779_v2 }
 0x307   :  { %v796_v7 = vmul.f32 %v790_v60, %v780_v4  ;;  %v797_v8 = vadd.f32 %v794_v5, %v793_v3 }
 0x309   :  { %798 = vadd.xlane.f32.xlu0 %v797_v8  ;;  %v800_v9 = vadd.f32 %v796_v7, %v795_v6 }
 0x30d   :  { %801 = vadd.xlane.f32.xlu0 %v800_v9 }
 0x396   :  { %v799_v15 = vpop.xlane.xlu0 %798 }
 0x397   :  { %v810_v16 = vadd.f32 %v898_v14, %v799_v15 }
 0x399   :  { %819 = vrot.lane.b32.xlu0 %v810_v16, %s1101_s30 }
 0x39a   :  { %v802_v17 = vpop.xlane.xlu0 %801 }
 0x39b   :  { %v811_v18 = vadd.f32 %v898_v14, %v802_v17 }
 0x39d   :  { %821 = vrot.lane.b32.xlu1 %v811_v18, %s1101_s30 }
 0x40b   :  { %v820_v19 = vpop.permute.xlu0 %819 }
 0x40c   :  { %826 = vst.msk [vmem:[%s1305_s13] sm:$0xff] %vm825_vm4, %v820_v19 }
 0x40f   :  { %v822_v20 = vpop.permute.xlu1 %821 }
 0x410   :  { %827 = vst.msk [vmem:[%s1305_s13 + $0x8] sm:$0xff] %vm825_vm4, %v822_v20 }
 0x411   :  { %832 = vsyncpa [#allocation4], 1 }
 0x412   :  { %833 = vsyncpa [#allocation6], 1 }

</bundles_post_ra>
